<compile_context>
chip_gen: v5e
topology: v5e:2x2
jax: 0.10.0
libtpu: 0.0.40
codegen_flags: <defaults>
</compile_context>

<pallas_src>
import functools

import numpy as np
import jax
import jax.numpy as jnp
from jax.experimental import pallas as pl
from jax.experimental.pallas import tpu as pltpu


def _round_up(a, m):
    return ((a + m - 1) // m) * m


def encoder_kernel(x_ref, w1_ref, b1_ref, w2_ref, b2_ref, w3_ref, b3_ref, o_ref):
    # Fused 3-layer MLP, ReLU after every layer.  Everything in f32: the kernel
    # is HBM-bandwidth-bound, so f32 matmuls (vs bf16) cost nothing on the wall
    # clock and keep exact parity with the PyTorch f32 forward pass.
    x = x_ref[...]
    h1 = jnp.maximum(
        jnp.dot(x, w1_ref[...], preferred_element_type=jnp.float32) + b1_ref[...], 0.0
    )
    h2 = jnp.maximum(
        jnp.dot(h1, w2_ref[...], preferred_element_type=jnp.float32) + b2_ref[...], 0.0
    )
    h3 = jnp.dot(h2, w3_ref[...], preferred_element_type=jnp.float32) + b3_ref[...]
    o_ref[...] = jnp.maximum(h3, 0.0)


@functools.partial(jax.jit, static_argnames=("tile_target",))
def encoder_forward(x, params, *, tile_target=512):
    """x: [B, input_size] float32. params: dict of (w1,b1,w2,b2,w3,b3), W as [in,out]."""
    B, D_in = x.shape
    w1, b1, w2, b2, w3, b3 = (params[k] for k in ("w1", "b1", "w2", "b2", "w3", "b3"))
    H1, H2, H3 = w1.shape[1], w2.shape[1], w3.shape[1]

    # Lane-dense output: pad the last layer out to a multiple of 128 lanes with
    # zero columns; the padded columns compute ReLU(0) = 0 and are sliced off
    # below (inside the same jit, so it fuses).
    H3p = _round_up(H3, 128)
    if H3p != H3:
        w3 = jnp.pad(w3, ((0, 0), (0, H3p - H3)))
        b3 = jnp.pad(b3, ((0, 0), (0, H3p - H3)))

    # Batch tiling:
    #  * B <= tile_target: one grid step (single-TC v5e/v6e — extra steps are
    #    pure per-step overhead; tiny batches badly underfeed the MXU anyway).
    #  * B  > tile_target: even number of large (>=256-row) tiles so the
    #    "parallel" axis splits evenly across the two v7x TensorCores.
    # Row alignment is 16 (packed sublane tile) to avoid hidden relayouts.
    if B <= tile_target:
        n_steps = 1
        tile_b = _round_up(max(B, 1), 16)
    else:
        n_steps = pl.cdiv(B, tile_target)
        n_steps += n_steps % 2  # even grid -> balanced megacore split
        tile_b = _round_up(pl.cdiv(B, n_steps), 16)
    B_pad = n_steps * tile_b
    if B_pad != B:
        x = jnp.pad(x, ((0, B_pad - B), (0, 0)))

    grid = (n_steps,)

    flops = 2 * B_pad * (D_in * H1 + H1 * H2 + H2 * H3p)
    bytes_accessed = (
        B_pad * D_in * 4
        + (w1.size + w2.size + w3.size) * 4
        + (b1.size + b2.size + b3.size) * 4
        + B_pad * H3p * 4
    )

    # TODO(synk): for very large img_size (D_in = 3*img^2 >> 10k) the resident
    # (D_in, H1) w1 block should be K-tiled over an extra "arbitrary" grid axis
    # with an f32 accumulator scratch to stay inside VMEM (matters first on
    # v7x's 64 MiB).  Not needed at these shapes.
    out = pl.pallas_call(
        encoder_kernel,
        out_shape=jax.ShapeDtypeStruct((B_pad, H3p), jnp.float32),
        grid_spec=pltpu.PrefetchScalarGridSpec(
            num_scalar_prefetch=0,
            grid=grid,
            in_specs=[
                # batch tile of the input (read straight from the caller's f32
                # array — no extra wrapper cast/copy pass over HBM).
                pl.BlockSpec((tile_b, D_in), lambda i: (i, 0)),
                # weights / biases: constant (0,0) block index -> stay resident
                # in VMEM across the grid, no re-DMA per step.
                pl.BlockSpec((D_in, H1), lambda i: (0, 0)),
                pl.BlockSpec((1, H1), lambda i: (0, 0)),
                pl.BlockSpec((H1, H2), lambda i: (0, 0)),
                pl.BlockSpec((1, H2), lambda i: (0, 0)),
                pl.BlockSpec((H2, H3p), lambda i: (0, 0)),
                pl.BlockSpec((1, H3p), lambda i: (0, 0)),
            ],
            out_specs=pl.BlockSpec((tile_b, H3p), lambda i: (i, 0)),
        ),
        compiler_params=pltpu.CompilerParams(
            dimension_semantics=("parallel",),
            vmem_limit_bytes=32 * 1024 * 1024,
        ),
        cost_estimate=pl.CostEstimate(
            flops=flops, transcendentals=0, bytes_accessed=bytes_accessed
        ),
    )(x, w1, b1, w2, b2, w3, b3)

    # Slice off batch padding and the zero lane-padding columns (fused by jit).
    return out[:B, :H3]


def init_params(key, input_size, encoding_dim):
    """Deterministic init mirroring PyTorch Linear's U(-1/sqrt(fan_in), 1/sqrt(fan_in))."""
    dims = [input_size, encoding_dim * 4, encoding_dim * 2, encoding_dim]
    params = {}
    keys = jax.random.split(key, 6)
    for idx in range(3):
        fan_in, fan_out = dims[idx], dims[idx + 1]
        bound = 1.0 / np.sqrt(fan_in)
        w = jax.random.uniform(
            keys[2 * idx], (fan_in, fan_out), jnp.float32, -bound, bound
        )
        b = jax.random.uniform(
            keys[2 * idx + 1], (1, fan_out), jnp.float32, -bound, bound
        )
        params[f"w{idx + 1}"] = w
        params[f"b{idx + 1}"] = b
    return params


def encoder_reference_numpy(x, params):
    """Pure-f32 host reference, numerically identical to the PyTorch module."""
    h = np.asarray(x, dtype=np.float32)
    for idx in range(3):
        w = np.asarray(params[f"w{idx + 1}"], dtype=np.float32)
        b = np.asarray(params[f"b{idx + 1}"], dtype=np.float32)
        h = np.maximum(h @ w + b, 0.0)
    return h


if __name__ == "__main__":
    img_size = 16
    encoding_dim = 32
    batch = 64

    input_size = 3 * img_size * img_size  # 768

    key = jax.random.PRNGKey(0)
    k_x, k_p = jax.random.split(key)
    # Input already flattened, exactly what the PyTorch Encoder.forward expects.
    x = jax.random.normal(k_x, (batch, input_size), dtype=jnp.float32)
    params = init_params(k_p, input_size, encoding_dim)

    out = jax.block_until_ready(encoder_forward(x, params))
    assert out.shape == (batch, encoding_dim)

    ref = encoder_reference_numpy(x, params)
    np.testing.assert_allclose(np.asarray(out), ref, rtol=2e-2, atol=2e-2)

    print("KERNEL_OK")
</pallas_src>

<mosaic_0001>
module attributes {stable_mosaic.version = 11 : i64} {
  func.func @encoder_kernel(%arg0: i32, %arg1: memref<64x768xf32, #tpu.memory_space<vmem>>, %arg2: memref<768x128xf32, #tpu.memory_space<vmem>>, %arg3: memref<1x128xf32, #tpu.memory_space<vmem>>, %arg4: memref<128x64xf32, #tpu.memory_space<vmem>>, %arg5: memref<1x64xf32, #tpu.memory_space<vmem>>, %arg6: memref<64x128xf32, #tpu.memory_space<vmem>>, %arg7: memref<1x128xf32, #tpu.memory_space<vmem>>, %arg8: memref<64x128xf32, #tpu.memory_space<vmem>>) attributes {dimension_semantics = [#tpu.dimension_semantics<parallel>], iteration_bounds = array<i64: 1>, scalar_prefetch = 0 : i64, scratch_operands = 0 : i64, tpu.core_type = #tpu.core_type<tc>, window_params = [{transform_indices = @transform_0, window_bounds = array<i64: 64, 768>}, {pipeline_mode = #tpu.pipeline_mode<synchronous>, transform_indices = @transform_1, window_bounds = array<i64: 768, 128>}, {pipeline_mode = #tpu.pipeline_mode<synchronous>, transform_indices = @transform_2, window_bounds = array<i64: 1, 128>}, {pipeline_mode = #tpu.pipeline_mode<synchronous>, transform_indices = @transform_3, window_bounds = array<i64: 128, 64>}, {pipeline_mode = #tpu.pipeline_mode<synchronous>, transform_indices = @transform_4, window_bounds = array<i64: 1, 64>}, {pipeline_mode = #tpu.pipeline_mode<synchronous>, transform_indices = @transform_5, window_bounds = array<i64: 64, 128>}, {pipeline_mode = #tpu.pipeline_mode<synchronous>, transform_indices = @transform_6, window_bounds = array<i64: 1, 128>}, {transform_indices = @transform_7, window_bounds = array<i64: 64, 128>}]} {
    %c0 = arith.constant 0 : index
    %c0_0 = arith.constant 0 : index
    %0 = vector.load %arg1[%c0, %c0_0] : memref<64x768xf32, #tpu.memory_space<vmem>>, vector<64x768xf32>
    %c0_1 = arith.constant 0 : index
    %c0_2 = arith.constant 0 : index
    %1 = vector.load %arg2[%c0_1, %c0_2] : memref<768x128xf32, #tpu.memory_space<vmem>>, vector<768x128xf32>
    %cst = arith.constant dense<0.000000e+00> : vector<64x128xf32>
    %2 = tpu.matmul %0, %1, %cst {dimension_numbers = #tpu.dot_dimension_numbers<[1], [0], [0], [1], [0, 0, 1, 1], [], []>} : vector<64x768xf32>, vector<768x128xf32>, vector<64x128xf32> -> vector<64x128xf32>
    %c0_3 = arith.constant 0 : index
    %c0_4 = arith.constant 0 : index
    %3 = vector.load %arg3[%c0_3, %c0_4] : memref<1x128xf32, #tpu.memory_space<vmem>>, vector<1x128xf32>
    %4 = vector.broadcast %3 : vector<1x128xf32> to vector<64x128xf32>
    %5 = arith.addf %2, %4 : vector<64x128xf32>
    %cst_5 = arith.constant 0.000000e+00 : f32
    %6 = vector.broadcast %cst_5 : f32 to vector<64x128xf32>
    %7 = arith.maximumf %5, %6 : vector<64x128xf32>
    %c0_6 = arith.constant 0 : index
    %c0_7 = arith.constant 0 : index
    %8 = vector.load %arg4[%c0_6, %c0_7] : memref<128x64xf32, #tpu.memory_space<vmem>>, vector<128x64xf32>
    %cst_8 = arith.constant dense<0.000000e+00> : vector<64x64xf32>
    %9 = tpu.matmul %7, %8, %cst_8 {dimension_numbers = #tpu.dot_dimension_numbers<[1], [0], [0], [1], [0, 0, 1, 1], [], []>} : vector<64x128xf32>, vector<128x64xf32>, vector<64x64xf32> -> vector<64x64xf32>
    %c0_9 = arith.constant 0 : index
    %c0_10 = arith.constant 0 : index
    %10 = vector.load %arg5[%c0_9, %c0_10] : memref<1x64xf32, #tpu.memory_space<vmem>>, vector<1x64xf32>
    %11 = vector.broadcast %10 : vector<1x64xf32> to vector<64x64xf32>
    %12 = arith.addf %9, %11 : vector<64x64xf32>
    %cst_11 = arith.constant 0.000000e+00 : f32
    %13 = vector.broadcast %cst_11 : f32 to vector<64x64xf32>
    %14 = arith.maximumf %12, %13 : vector<64x64xf32>
    %c0_12 = arith.constant 0 : index
    %c0_13 = arith.constant 0 : index
    %15 = vector.load %arg6[%c0_12, %c0_13] : memref<64x128xf32, #tpu.memory_space<vmem>>, vector<64x128xf32>
    %cst_14 = arith.constant dense<0.000000e+00> : vector<64x128xf32>
    %16 = tpu.matmul %14, %15, %cst_14 {dimension_numbers = #tpu.dot_dimension_numbers<[1], [0], [0], [1], [0, 0, 1, 1], [], []>} : vector<64x64xf32>, vector<64x128xf32>, vector<64x128xf32> -> vector<64x128xf32>
    %c0_15 = arith.constant 0 : index
    %c0_16 = arith.constant 0 : index
    %17 = vector.load %arg7[%c0_15, %c0_16] : memref<1x128xf32, #tpu.memory_space<vmem>>, vector<1x128xf32>
    %18 = vector.broadcast %17 : vector<1x128xf32> to vector<64x128xf32>
    %19 = arith.addf %16, %18 : vector<64x128xf32>
    %cst_17 = arith.constant 0.000000e+00 : f32
    %20 = vector.broadcast %cst_17 : f32 to vector<64x128xf32>
    %21 = arith.maximumf %19, %20 : vector<64x128xf32>
    %c0_18 = arith.constant 0 : index
    %c0_19 = arith.constant 0 : index
    %22 = vector.load %arg8[%c0_18, %c0_19] : memref<64x128xf32, #tpu.memory_space<vmem>>, vector<64x128xf32>
    tpu.vector_store %arg8[%c0_18, %c0_19], %21 {strides = array<i32>} : memref<64x128xf32, #tpu.memory_space<vmem>>, vector<64x128xf32>,
    return
  }
  func.func @transform_0(%arg0: i32) -> (i32, i32) {
    %c0_i32 = arith.constant 0 : i32
    %c0_i32_0 = arith.constant 0 : i32
    return %arg0, %c0_i32 : i32, i32
  }
  func.func @transform_1(%arg0: i32) -> (i32, i32) {
    %c0_i32 = arith.constant 0 : i32
    %c0_i32_0 = arith.constant 0 : i32
    %c0_i32_1 = arith.constant 0 : i32
    return %c0_i32, %c0_i32_0 : i32, i32
  }
  func.func @transform_2(%arg0: i32) -> (i32, i32) {
    %c0_i32 = arith.constant 0 : i32
    %c0_i32_0 = arith.constant 0 : i32
    %c0_i32_1 = arith.constant 0 : i32
    return %c0_i32, %c0_i32_0 : i32, i32
  }
  func.func @transform_3(%arg0: i32) -> (i32, i32) {
    %c0_i32 = arith.constant 0 : i32
    %c0_i32_0 = arith.constant 0 : i32
    %c0_i32_1 = arith.constant 0 : i32
    return %c0_i32, %c0_i32_0 : i32, i32
  }
  func.func @transform_4(%arg0: i32) -> (i32, i32) {
    %c0_i32 = arith.constant 0 : i32
    %c0_i32_0 = arith.constant 0 : i32
    %c0_i32_1 = arith.constant 0 : i32
    return %c0_i32, %c0_i32_0 : i32, i32
  }
  func.func @transform_5(%arg0: i32) -> (i32, i32) {
    %c0_i32 = arith.constant 0 : i32
    %c0_i32_0 = arith.constant 0 : i32
    %c0_i32_1 = arith.constant 0 : i32
    return %c0_i32, %c0_i32_0 : i32, i32
  }
  func.func @transform_6(%arg0: i32) -> (i32, i32) {
    %c0_i32 = arith.constant 0 : i32
    %c0_i32_0 = arith.constant 0 : i32
    %c0_i32_1 = arith.constant 0 : i32
    return %c0_i32, %c0_i32_0 : i32, i32
  }
  func.func @transform_7(%arg0: i32) -> (i32, i32) {
    %c0_i32 = arith.constant 0 : i32
    %c0_i32_0 = arith.constant 0 : i32
    return %arg0, %c0_i32 : i32, i32
  }
}

</mosaic_0001>

<bundles_post_ra>
// kernel: encoder_forward.1
= control target key start
LH: loop header
LB: loop body
LE: loop exit
PB: predicated region body
PF: predicated region fallthrough
CT: control target
= control target key end

     0   :  { %12 = vsyncpa [#allocation3], 0  ;;  %s652_s27 = smov [#allocation2]   ;;  %s653_s29 = smov 128   ;;  %s980_s0 = inlined_call_operand.vmem [shape: f32[64,768], index: 0, kind: input, shape index: {}]   ;;  %s981_s1 = inlined_call_operand.hbm [shape: f32[768,128], index: 1, kind: input, shape index: {}]   ;;  %s982_s2 = inlined_call_operand.vmem [shape: f32[1,128], index: 2, kind: input, shape index: {}]   ;;  %s983_s3 = inlined_call_operand.vmem [shape: f32[128,64], index: 3, kind: input, shape index: {}]   ;;  %s984_s4 = inlined_call_operand.vmem [shape: f32[1,64], index: 4, kind: input, shape index: {}]   ;;  %s985_s5 = inlined_call_operand.vmem [shape: f32[64,128], index: 5, kind: input, shape index: {}]   ;;  %s986_s6 = inlined_call_operand.vmem [shape: f32[1,128], index: 6, kind: input, shape index: {}]   ;;  %s987_s7 = inlined_call_operand.vmem [shape: f32[64,128], index: 7, kind: output, shape index: {}]  }
   0x1   :  { %s19_s26 = sshll.u32 %s981_s1, 4  ;;  %s21_s28 = sshll.u32 %s652_s27, 4  ;;  %s20_s26 = int_to_ptr.hbm [resolvable:$true] %s19_s26  ;;  %s22_s28 = int_to_ptr.vmem [resolvable:$true] %s21_s28 }
   0x2   :  { %s654_s30 = smov 8  }
   0x3   :  { %27 = dma.hbm_to_vmem [thread:$0]  %s20_s26, 12288, %s22_s28, [#allocation3], %s653_s29, %s653_s29, %s654_s30  }
   0x4   :  { %650 = dma.done.wait [#allocation3], 12288  }
   0x5   :  { %651 = vsyncadd [#allocation3], 4294955008  ;;  %v105_v0 = vld [vmem:[#allocation2 + $0x78] sm:$0xff]  ;;  %v104_v2 = vld [vmem:[#allocation2 + $0x70] sm:$0xff]  ;;  %vm525_vm0 = vcmask 523264  }
   0x6   :  { %v137_v1 = vld [vmem:[#allocation2 + $0x178] sm:$0xff]  ;;  %190 = vmatpush.msra.mxu0 %v105_v0  ;;  %v136_v4 = vld [vmem:[#allocation2 + $0x170] sm:$0xff]  ;;  %v103_v6 = vld [vmem:[#allocation2 + $0x68] sm:$0xff] }
   0x7   :  { %272 = vmatpush.msra.mxu2 %v137_v1  ;;  %v121_v3 = vld [vmem:[#allocation2 + $0xf8] sm:$0xff]  ;;  %v120_v7 = vld [vmem:[#allocation2 + $0xf0] sm:$0xff]  ;;  %v135_v8 = vld [vmem:[#allocation2 + $0x168] sm:$0xff] }
   0x8   :  { %v153_v5 = vld [vmem:[#allocation2 + $0x1f8] sm:$0xff]  ;;  %231 = vmatpush.msra.mxu1 %v121_v3  ;;  %191 = vmatpush.msra.mxu0 %v104_v2  ;;  %v152_v9 = vld [vmem:[#allocation2 + $0x1f0] sm:$0xff]  ;;  %v119_v10 = vld [vmem:[#allocation2 + $0xe8] sm:$0xff] }
   0x9   :  { %313 = vmatpush.msra.mxu3 %v153_v5  ;;  %273 = vmatpush.msra.mxu2 %v136_v4  ;;  %v102_v11 = vld [vmem:[#allocation2 + $0x60] sm:$0xff]  ;;  %v151_v13 = vld [vmem:[#allocation2 + $0x1e8] sm:$0xff]  ;;  %v101_v16 = vld [vmem:[#allocation2 + $0x58] sm:$0xff] }
   0xa   :  { %232 = vmatpush.msra.mxu1 %v120_v7  ;;  %v134_v12 = vld [vmem:[#allocation2 + $0x160] sm:$0xff]  ;;  %192 = vmatpush.msra.mxu0 %v103_v6  ;;  %v133_v17 = vld [vmem:[#allocation2 + $0x158] sm:$0xff]  ;;  %v100_v20 = vld [vmem:[#allocation2 + $0x50] sm:$0xff] }
   0xb   :  { %314 = vmatpush.msra.mxu3 %v152_v9  ;;  %274 = vmatpush.msra.mxu2 %v135_v8  ;;  %v118_v14 = vld [vmem:[#allocation2 + $0xe0] sm:$0xff]  ;;  %v117_v18 = vld [vmem:[#allocation2 + $0xd8] sm:$0xff]  ;;  %v132_v21 = vld [vmem:[#allocation2 + $0x150] sm:$0xff] }
   0xc   :  { %v150_v15 = vld [vmem:[#allocation2 + $0x1e0] sm:$0xff]  ;;  %233 = vmatpush.msra.mxu1 %v119_v10  ;;  %193 = vmatpush.msra.mxu0 %v102_v11  ;;  %v149_v19 = vld [vmem:[#allocation2 + $0x1d8] sm:$0xff]  ;;  %v116_v22 = vld [vmem:[#allocation2 + $0xd0] sm:$0xff] }
   0xd   :  { %315 = vmatpush.msra.mxu3 %v151_v13  ;;  %275 = vmatpush.msra.mxu2 %v134_v12  ;;  %v148_v23 = vld [vmem:[#allocation2 + $0x1d0] sm:$0xff]  ;;  %v99_v24 = vld [vmem:[#allocation2 + $0x48] sm:$0xff]  ;;  %v98_v28 = vld [vmem:[#allocation2 + $0x40] sm:$0xff] }
   0xe   :  { %234 = vmatpush.msra.mxu1 %v118_v14  ;;  %194 = vmatpush.msra.mxu0 %v101_v16  ;;  %v131_v25 = vld [vmem:[#allocation2 + $0x148] sm:$0xff]  ;;  %v130_v29 = vld [vmem:[#allocation2 + $0x140] sm:$0xff]  ;;  %v97_v32 = vld [vmem:[#allocation2 + $0x38] sm:$0xff] }
   0xf   :  { %316 = vmatpush.msra.mxu3 %v150_v15  ;;  %276 = vmatpush.msra.mxu2 %v133_v17  ;;  %v115_v26 = vld [vmem:[#allocation2 + $0xc8] sm:$0xff]  ;;  %v114_v30 = vld [vmem:[#allocation2 + $0xc0] sm:$0xff]  ;;  %v129_v33 = vld [vmem:[#allocation2 + $0x138] sm:$0xff] }
  0x10   :  { %235 = vmatpush.msra.mxu1 %v117_v18  ;;  %195 = vmatpush.msra.mxu0 %v100_v20  ;;  %v147_v27 = vld [vmem:[#allocation2 + $0x1c8] sm:$0xff]  ;;  %v146_v31 = vld [vmem:[#allocation2 + $0x1c0] sm:$0xff]  ;;  %v113_v34 = vld [vmem:[#allocation2 + $0xb8] sm:$0xff] }
  0x11   :  { %317 = vmatpush.msra.mxu3 %v149_v19  ;;  %277 = vmatpush.msra.mxu2 %v132_v21  ;;  %v145_v35 = vld [vmem:[#allocation2 + $0x1b8] sm:$0xff]  ;;  %v96_v36 = vld [vmem:[#allocation2 + $0x30] sm:$0xff]  ;;  %v95_v40 = vld [vmem:[#allocation2 + $0x28] sm:$0xff] }
  0x12   :  { %236 = vmatpush.msra.mxu1 %v116_v22  ;;  %196 = vmatpush.msra.mxu0 %v99_v24  ;;  %v128_v37 = vld [vmem:[#allocation2 + $0x130] sm:$0xff]  ;;  %v127_v41 = vld [vmem:[#allocation2 + $0x128] sm:$0xff]  ;;  %v94_v44 = vld [vmem:[#allocation2 + $0x20] sm:$0xff] }
  0x13   :  { %318 = vmatpush.msra.mxu3 %v148_v23  ;;  %278 = vmatpush.msra.mxu2 %v131_v25  ;;  %v112_v38 = vld [vmem:[#allocation2 + $0xb0] sm:$0xff]  ;;  %v111_v42 = vld [vmem:[#allocation2 + $0xa8] sm:$0xff]  ;;  %v126_v45 = vld [vmem:[#allocation2 + $0x120] sm:$0xff] }
  0x14   :  { %237 = vmatpush.msra.mxu1 %v115_v26  ;;  %197 = vmatpush.msra.mxu0 %v98_v28  ;;  %v144_v39 = vld [vmem:[#allocation2 + $0x1b0] sm:$0xff]  ;;  %v143_v43 = vld [vmem:[#allocation2 + $0x1a8] sm:$0xff]  ;;  %v110_v46 = vld [vmem:[#allocation2 + $0xa0] sm:$0xff] }
  0x15   :  { %319 = vmatpush.msra.mxu3 %v147_v27  ;;  %279 = vmatpush.msra.mxu2 %v130_v29  ;;  %v142_v47 = vld [vmem:[#allocation2 + $0x1a0] sm:$0xff]  ;;  %v93_v48 = vld [vmem:[#allocation2 + $0x18] sm:$0xff]  ;;  %v92_v52 = vld [vmem:[#allocation2 + $0x10] sm:$0xff] }
  0x16   :  { %238 = vmatpush.msra.mxu1 %v114_v30  ;;  %198 = vmatpush.msra.mxu0 %v97_v32  ;;  %v125_v49 = vld [vmem:[#allocation2 + $0x118] sm:$0xff]  ;;  %v124_v53 = vld [vmem:[#allocation2 + $0x110] sm:$0xff]  ;;  %v91_v56 = vld [vmem:[#allocation2 + $0x8] sm:$0xff] }
  0x17   :  { %320 = vmatpush.msra.mxu3 %v146_v31  ;;  %280 = vmatpush.msra.mxu2 %v129_v33  ;;  %v109_v50 = vld [vmem:[#allocation2 + $0x98] sm:$0xff]  ;;  %v108_v54 = vld [vmem:[#allocation2 + $0x90] sm:$0xff]  ;;  %v123_v57 = vld [vmem:[#allocation2 + $0x108] sm:$0xff] }
  0x18   :  { %239 = vmatpush.msra.mxu1 %v113_v34  ;;  %199 = vmatpush.msra.mxu0 %v96_v36  ;;  %v141_v51 = vld [vmem:[#allocation2 + $0x198] sm:$0xff]  ;;  %v140_v55 = vld [vmem:[#allocation2 + $0x190] sm:$0xff]  ;;  %v107_v58 = vld [vmem:[#allocation2 + $0x88] sm:$0xff] }
  0x19   :  { %321 = vmatpush.msra.mxu3 %v145_v35  ;;  %281 = vmatpush.msra.mxu2 %v128_v37  ;;  %v139_v59 = vld [vmem:[#allocation2 + $0x188] sm:$0xff]  ;;  %v90_v60 = vld [vmem:[#allocation2] sm:$0xff]  ;;  %v44_v63 = vld [vmem:[%s980_s0 + $0x10] sm:$0xff] }
  0x1a   :  { %240 = vmatpush.msra.mxu1 %v112_v38  ;;  %200 = vmatpush.msra.mxu0 %v95_v40  ;;  %v122_v61 = vld [vmem:[#allocation2 + $0x100] sm:$0xff]  ;;  %v169_v0 = vld [vmem:[#allocation2 + $0x278] sm:$0xff]  ;;  %v43_v3 = vld [vmem:[%s980_s0 + $0x8] sm:$0xff] }
  0x1b   :  { %322 = vmatpush.msra.mxu3 %v144_v39  ;;  %282 = vmatpush.msra.mxu2 %v127_v41  ;;  %v42_v62 = vld [vmem:[%s980_s0] sm:$0xff]  ;;  %v45_v4 = vld [vmem:[%s980_s0 + $0x18] sm:$0xff]  ;;  %v168_v6 = vld [vmem:[#allocation2 + $0x270] sm:$0xff] }
  0x1c   :  { %241 = vmatpush.msra.mxu1 %v111_v42  ;;  %201 = vmatpush.msra.mxu0 %v94_v44  ;;  %v106_v1 = vld [vmem:[#allocation2 + $0x80] sm:$0xff]  ;;  %v185_v5 = vld [vmem:[#allocation2 + $0x2f8] sm:$0xff]  ;;  %v184_v7 = vld [vmem:[#allocation2 + $0x2f0] sm:$0xff] }
  0x1d   :  { %323 = vmatpush.msra.mxu3 %v143_v43  ;;  %283 = vmatpush.msra.mxu2 %v126_v45  ;;  %v138_v2 = vld [vmem:[#allocation2 + $0x180] sm:$0xff]  ;;  %v167_v8 = vld [vmem:[#allocation2 + $0x268] sm:$0xff]  ;;  %v48_v10 = vld [vmem:[%s980_s0 + $0x30] sm:$0xff] }
  0x1e   :  { %242 = vmatpush.msra.mxu1 %v110_v46  ;;  %202 = vmatpush.msra.mxu0 %v93_v48  ;;  %v183_v9 = vld [vmem:[#allocation2 + $0x2e8] sm:$0xff]  ;;  %v50_v11 = vld [vmem:[%s980_s0 + $0x40] sm:$0xff]  ;;  %v49_v14 = vld [vmem:[%s980_s0 + $0x38] sm:$0xff] }
  0x1f   :  { %324 = vmatpush.msra.mxu3 %v142_v47  ;;  %284 = vmatpush.msra.mxu2 %v125_v49  ;;  %v166_v12 = vld [vmem:[#allocation2 + $0x260] sm:$0xff]  ;;  %v51_v15 = vld [vmem:[%s980_s0 + $0x48] sm:$0xff]  ;;  %v165_v16 = vld [vmem:[#allocation2 + $0x258] sm:$0xff] }
  0x20   :  { %243 = vmatpush.msra.mxu1 %v109_v50  ;;  %203 = vmatpush.msra.mxu0 %v92_v52  ;;  %v182_v13 = vld [vmem:[#allocation2 + $0x2e0] sm:$0xff]  ;;  %v181_v17 = vld [vmem:[#allocation2 + $0x2d8] sm:$0xff]  ;;  %v164_v18 = vld [vmem:[#allocation2 + $0x250] sm:$0xff] }
  0x21   :  { %325 = vmatpush.msra.mxu3 %v141_v51  ;;  %285 = vmatpush.msra.mxu2 %v124_v53  ;;  %v180_v19 = vld [vmem:[#allocation2 + $0x2d0] sm:$0xff]  ;;  %v163_v20 = vld [vmem:[#allocation2 + $0x248] sm:$0xff]  ;;  %v54_v21 = vld [vmem:[%s980_s0 + $0x60] sm:$0xff] }
  0x22   :  { %244 = vmatpush.msra.mxu1 %v108_v54  ;;  %204 = vmatpush.msra.mxu0 %v91_v56  ;;  %v56_v22 = vld [vmem:[%s980_s0 + $0x70] sm:$0xff]  ;;  %v179_v23 = vld [vmem:[#allocation2 + $0x2c8] sm:$0xff]  ;;  %v162_v24 = vld [vmem:[#allocation2 + $0x240] sm:$0xff] }
  0x23   :  { %326 = vmatpush.msra.mxu3 %v140_v55  ;;  %286 = vmatpush.msra.mxu2 %v123_v57  ;;  %v55_v25 = vld [vmem:[%s980_s0 + $0x68] sm:$0xff]  ;;  %v57_v26 = vld [vmem:[%s980_s0 + $0x78] sm:$0xff]  ;;  %v178_v27 = vld [vmem:[#allocation2 + $0x2c0] sm:$0xff] }
  0x24   :  { %245 = vmatpush.msra.mxu1 %v107_v58  ;;  %205 = vmatpush.msra.mxu0 %v90_v60  ;;  %v161_v28 = vld [vmem:[#allocation2 + $0x238] sm:$0xff]  ;;  %v160_v30 = vld [vmem:[#allocation2 + $0x230] sm:$0xff]  ;;  %v62_v33 = vld [vmem:[%s980_s0 + $0xa0] sm:$0xff] }
  0x25   :  { %327 = vmatpush.msra.mxu3 %v139_v59  ;;  %287 = vmatpush.msra.mxu2 %v122_v61  ;;  %v177_v29 = vld [vmem:[#allocation2 + $0x2b8] sm:$0xff]  ;;  %v176_v31 = vld [vmem:[#allocation2 + $0x2b0] sm:$0xff]  ;;  %v159_v34 = vld [vmem:[#allocation2 + $0x228] sm:$0xff] }
  0x26   :  { %206 = vmatmul.f32.vlgmr.msra.gmra.mxu0 %v42_v62  ;;  %288 = vmatmul.f32.vlgmr.msra.gmra.mxu2 %v44_v63  ;;  %v60_v32 = vld [vmem:[%s980_s0 + $0x90] sm:$0xff]  ;;  %v175_v35 = vld [vmem:[#allocation2 + $0x2a8] sm:$0xff]  ;;  %v61_v36 = vld [vmem:[%s980_s0 + $0x98] sm:$0xff] }
  0x27   :  { %354 = vmatpush.msrb.mxu0 %v169_v0  ;;  %246 = vmatpush.msra.mxu1 %v106_v1  ;;  %v63_v37 = vld [vmem:[%s980_s0 + $0xa8] sm:$0xff]  ;;  %v158_v38 = vld [vmem:[#allocation2 + $0x220] sm:$0xff]  ;;  %v157_v40 = vld [vmem:[#allocation2 + $0x218] sm:$0xff] }
  0x28   :  { %328 = vmatpush.msra.mxu3 %v138_v2  ;;  %247 = vmatmul.f32.vlgmr.msra.gmra.mxu1 %v43_v3  ;;  %v174_v39 = vld [vmem:[#allocation2 + $0x2a0] sm:$0xff]  ;;  %v173_v41 = vld [vmem:[#allocation2 + $0x298] sm:$0xff]  ;;  %v156_v42 = vld [vmem:[#allocation2 + $0x210] sm:$0xff] }
  0x29   :  { %329 = vmatmul.f32.vlgmr.msra.gmra.mxu3 %v45_v4  ;;  %395 = vmatpush.msrb.mxu1 %v185_v5  ;;  %v66_v43 = vld [vmem:[%s980_s0 + $0xc0] sm:$0xff]  ;;  %v68_v44 = vld [vmem:[%s980_s0 + $0xd0] sm:$0xff]  ;;  %v155_v46 = vld [vmem:[#allocation2 + $0x208] sm:$0xff] }
  0x2a   :  { %355 = vmatpush.msrb.mxu0 %v168_v6  ;;  %v172_v45 = vld [vmem:[#allocation2 + $0x290] sm:$0xff]  ;;  %v67_v47 = vld [vmem:[%s980_s0 + $0xc8] sm:$0xff]  ;;  %v69_v48 = vld [vmem:[%s980_s0 + $0xd8] sm:$0xff] }
  0x2b   :  { %396 = vmatpush.msrb.mxu1 %v184_v7  ;;  %v171_v49 = vld [vmem:[#allocation2 + $0x288] sm:$0xff]  ;;  %v154_v50 = vld [vmem:[#allocation2 + $0x200] sm:$0xff]  ;;  %v72_v52 = vld [vmem:[%s980_s0 + $0xf0] sm:$0xff] }
  0x2c   :  { %356 = vmatpush.msrb.mxu0 %v167_v8  ;;  %v170_v51 = vld [vmem:[#allocation2 + $0x280] sm:$0xff]  ;;  %v73_v54 = vld [vmem:[%s980_s0 + $0xf8] sm:$0xff]  ;;  %v75_v55 = vld [vmem:[%s980_s0 + $0x108] sm:$0xff] }
  0x2d   :  { %397 = vmatpush.msrb.mxu1 %v183_v9  ;;  %v74_v53 = vld [vmem:[%s980_s0 + $0x100] sm:$0xff]  ;;  %v80_v57 = vld [vmem:[%s980_s0 + $0x130] sm:$0xff]  ;;  %v79_v58 = vld [vmem:[%s980_s0 + $0x128] sm:$0xff] }
  0x2e   :  { %209 = vmatmul.f32.gmra.mxu0 %v48_v10  ;;  %291 = vmatmul.f32.gmra.mxu2 %v50_v11  ;;  %v78_v56 = vld [vmem:[%s980_s0 + $0x120] sm:$0xff]  ;;  %v81_v59 = vld [vmem:[%s980_s0 + $0x138] sm:$0xff]  ;;  %v84_v60 = vld [vmem:[%s980_s0 + $0x150] sm:$0xff] }
  0x2f   :  { %357 = vmatpush.msrb.mxu0 %v166_v12  ;;  %398 = vmatpush.msrb.mxu1 %v182_v13  ;;  %v86_v61 = vld [vmem:[%s980_s0 + $0x160] sm:$0xff]  ;;  %v85_v62 = vld [vmem:[%s980_s0 + $0x158] sm:$0xff]  ;;  %v87_v63 = vld [vmem:[%s980_s0 + $0x168] sm:$0xff] }
  0x30   :  { %250 = vmatmul.f32.gmra.mxu1 %v49_v14  ;;  %v46_v0 = vld [vmem:[%s980_s0 + $0x20] sm:$0xff]  ;;  %v47_v1 = vld [vmem:[%s980_s0 + $0x28] sm:$0xff]  ;;  %v52_v2 = vld [vmem:[%s980_s0 + $0x50] sm:$0xff] }
  0x31   :  { %332 = vmatmul.f32.gmra.mxu3 %v51_v15  ;;  %358 = vmatpush.msrb.mxu0 %v165_v16  ;;  %v53_v3 = vld [vmem:[%s980_s0 + $0x58] sm:$0xff]  ;;  %v58_v4 = vld [vmem:[%s980_s0 + $0x80] sm:$0xff]  ;;  %v59_v5 = vld [vmem:[%s980_s0 + $0x88] sm:$0xff] }
  0x32   :  { %399 = vmatpush.msrb.mxu1 %v181_v17  ;;  %v64_v6 = vld [vmem:[%s980_s0 + $0xb0] sm:$0xff]  ;;  %v65_v7 = vld [vmem:[%s980_s0 + $0xb8] sm:$0xff]  ;;  %v70_v8 = vld [vmem:[%s980_s0 + $0xe0] sm:$0xff] }
  0x33   :  { %359 = vmatpush.msrb.mxu0 %v164_v18  ;;  %v71_v9 = vld [vmem:[%s980_s0 + $0xe8] sm:$0xff]  ;;  %v459_v10 = vld [vmem:[%s983_s3 + $0x78] sm:$0xff]  ;;  %v76_v11 = vld [vmem:[%s980_s0 + $0x110] sm:$0xff] }
  0x34   :  { %400 = vmatpush.msrb.mxu1 %v180_v19  ;;  %464 = vmatpush.msrb.mxu2 %v459_v10  ;;  %v77_v12 = vld [vmem:[%s980_s0 + $0x118] sm:$0xff]  ;;  %v458_v13 = vld [vmem:[%s983_s3 + $0x70] sm:$0xff]  ;;  %v457_v14 = vld [vmem:[%s983_s3 + $0x68] sm:$0xff] }
  0x35   :  { %360 = vmatpush.msrb.mxu0 %v163_v20  ;;  %v82_v15 = vld [vmem:[%s980_s0 + $0x140] sm:$0xff]  ;;  %v83_v16 = vld [vmem:[%s980_s0 + $0x148] sm:$0xff]  ;;  %v455_v18 = vld [vmem:[%s983_s3 + $0x58] sm:$0xff] }
  0x36   :  { %212 = vmatmul.f32.gmra.mxu0 %v54_v21  ;;  %294 = vmatmul.f32.gmra.mxu2 %v56_v22  ;;  %v456_v17 = vld [vmem:[%s983_s3 + $0x60] sm:$0xff]  ;;  %v88_v19 = vld [vmem:[%s980_s0 + $0x170] sm:$0xff]  ;;  %v89_v20 = vld [vmem:[%s980_s0 + $0x178] sm:$0xff] }
  0x37   :  { %401 = vmatpush.msrb.mxu1 %v179_v23  ;;  %361 = vmatpush.msrb.mxu0 %v162_v24  ;;  %v454_v21 = vld [vmem:[%s983_s3 + $0x50] sm:$0xff]  ;;  %v453_v22 = vld [vmem:[%s983_s3 + $0x48] sm:$0xff] }
  0x38   :  { %253 = vmatmul.f32.gmra.mxu1 %v55_v25  ;;  %465 = vmatpush.msrb.mxu2 %v458_v13  ;;  %v452_v25 = vld [vmem:[%s983_s3 + $0x40] sm:$0xff] }
  0x39   :  { %335 = vmatmul.f32.gmra.mxu3 %v57_v26  ;;  %402 = vmatpush.msrb.mxu1 %v178_v27  ;;  %v451_v26 = vld [vmem:[%s983_s3 + $0x38] sm:$0xff] }
  0x3a   :  { %362 = vmatpush.msrb.mxu0 %v161_v28  ;;  %466 = vmatpush.msrb.mxu2 %v457_v14 }
  0x3b   :  { %403 = vmatpush.msrb.mxu1 %v177_v29  ;;  %v450_v29 = vld [vmem:[%s983_s3 + $0x30] sm:$0xff] }
  0x3c   :  { %363 = vmatpush.msrb.mxu0 %v160_v30  ;;  %467 = vmatpush.msrb.mxu2 %v456_v17  ;;  %v449_v30 = vld [vmem:[%s983_s3 + $0x28] sm:$0xff] }
  0x3d   :  { %404 = vmatpush.msrb.mxu1 %v176_v31 }
  0x3e   :  { %215 = vmatmul.f32.gmra.mxu0 %v60_v32  ;;  %297 = vmatmul.f32.gmra.mxu2 %v62_v33  ;;  %v448_v33 = vld [vmem:[%s983_s3 + $0x20] sm:$0xff] }
  0x3f   :  { %364 = vmatpush.msrb.mxu0 %v159_v34  ;;  %405 = vmatpush.msrb.mxu1 %v175_v35  ;;  %v447_v34 = vld [vmem:[%s983_s3 + $0x18] sm:$0xff] }
  0x40   :  { %256 = vmatmul.f32.gmra.mxu1 %v61_v36  ;;  %468 = vmatpush.msrb.mxu2 %v455_v18 }
  0x41   :  { %338 = vmatmul.f32.gmra.mxu3 %v63_v37  ;;  %365 = vmatpush.msrb.mxu0 %v158_v38  ;;  %v446_v37 = vld [vmem:[%s983_s3 + $0x10] sm:$0xff]  ;;  %v445_v38 = vld [vmem:[%s983_s3 + $0x8] sm:$0xff] }
  0x42   :  { %406 = vmatpush.msrb.mxu1 %v174_v39  ;;  %469 = vmatpush.msrb.mxu2 %v454_v21 }
  0x43   :  { %366 = vmatpush.msrb.mxu0 %v157_v40 }
  0x44   :  { %407 = vmatpush.msrb.mxu1 %v173_v41  ;;  %470 = vmatpush.msrb.mxu2 %v453_v22  ;;  %v444_v41 = vld [vmem:[%s983_s3] sm:$0xff] }
  0x45   :  { %367 = vmatpush.msrb.mxu0 %v156_v42 }
  0x46   :  { %218 = vmatmul.f32.gmra.mxu0 %v66_v43  ;;  %300 = vmatmul.f32.gmra.mxu2 %v68_v44 }
  0x47   :  { %408 = vmatpush.msrb.mxu1 %v172_v45  ;;  %368 = vmatpush.msrb.mxu0 %v155_v46 }
  0x48   :  { %259 = vmatmul.f32.gmra.mxu1 %v67_v47  ;;  %471 = vmatpush.msrb.mxu2 %v452_v25  ;;  %v897_v47 = vld [vmem:[%s982_s2] ss:$0 sm:$0xff] }
  0x49   :  { %341 = vmatmul.f32.gmra.mxu3 %v69_v48  ;;  %409 = vmatpush.msrb.mxu1 %v171_v49 }
  0x4a   :  { %369 = vmatpush.msrb.mxu0 %v154_v50  ;;  %472 = vmatpush.msrb.mxu2 %v451_v26 }
  0x4b   :  { %410 = vmatpush.msrb.mxu1 %v170_v51 }
  0x4c   :  { %473 = vmatpush.msrb.mxu2 %v450_v29 }
  0x4e   :  { %221 = vmatmul.f32.gmra.mxu0 %v72_v52  ;;  %303 = vmatmul.f32.gmra.mxu2 %v74_v53 }
  0x4f   :  { %474 = vmatpush.msrb.mxu2 %v449_v30 }
  0x50   :  { %262 = vmatmul.f32.gmra.mxu1 %v73_v54 }
  0x51   :  { %344 = vmatmul.f32.gmra.mxu3 %v75_v55  ;;  %475 = vmatpush.msrb.mxu2 %v448_v33 }
  0x53   :  { %476 = vmatpush.msrb.mxu2 %v447_v34 }
  0x55   :  { %477 = vmatpush.msrb.mxu2 %v446_v37  ;;  %v520_v37 = vld [vmem:[%s985_s5 + $0x38] sm:$0xff] }
  0x56   :  { %224 = vmatmul.f32.gmra.mxu0 %v78_v56  ;;  %306 = vmatmul.f32.gmra.mxu2 %v80_v57 }
  0x57   :  { %478 = vmatpush.msrb.mxu2 %v445_v38  ;;  %v519_v38 = vld [vmem:[%s985_s5 + $0x30] sm:$0xff]  ;;  %558 = vmatpush.msrb.mxu3 %v520_v37 }
  0x58   :  { %265 = vmatmul.f32.gmra.mxu1 %v79_v58 }
  0x59   :  { %347 = vmatmul.f32.gmra.mxu3 %v81_v59  ;;  %479 = vmatpush.msrb.mxu2 %v444_v41 }
  0x5a   :  { %559 = vmatpush.msrb.mxu3 %v519_v38 }
  0x5e   :  { %227 = vmatmul.f32.gmra.mxu0 %v84_v60  ;;  %309 = vmatmul.f32.gmra.mxu2 %v86_v61 }
  0x60   :  { %268 = vmatmul.f32.gmra.mxu1 %v85_v62 }
  0x61   :  { %350 = vmatmul.f32.gmra.mxu3 %v87_v63 }
  0x66   :  { %370 = vmatmul.f32.vlgmr.msrb.gmra.mxu0 %v46_v0 }
  0x68   :  { %411 = vmatmul.f32.vlgmr.msrb.gmra.mxu1 %v47_v1 }
  0x6e   :  { %373 = vmatmul.f32.gmra.mxu0 %v52_v2 }
  0x70   :  { %414 = vmatmul.f32.gmra.mxu1 %v53_v3 }
  0x76   :  { %376 = vmatmul.f32.gmra.mxu0 %v58_v4 }
  0x78   :  { %417 = vmatmul.f32.gmra.mxu1 %v59_v5 }
  0x7e   :  { %379 = vmatmul.f32.gmra.mxu0 %v64_v6 }
  0x80   :  { %420 = vmatmul.f32.gmra.mxu1 %v65_v7 }
  0x86   :  { %382 = vmatmul.f32.gmra.mxu0 %v70_v8 }
  0x88   :  { %423 = vmatmul.f32.gmra.mxu1 %v71_v9 }
  0x8e   :  { %385 = vmatmul.f32.gmra.mxu0 %v76_v11 }
  0x90   :  { %426 = vmatmul.f32.gmra.mxu1 %v77_v12 }
  0x96   :  { %388 = vmatmul.f32.gmra.mxu0 %v82_v15 }
  0x98   :  { %429 = vmatmul.f32.gmra.mxu1 %v83_v16 }
  0x9e   :  { %391 = vmatmul.f32.gmra.mxu0 %v88_v19 }
  0xa0   :  { %432 = vmatmul.f32.gmra.mxu1 %v89_v20 }
  0xa3   :  { %v207_v23 = vpop.f32.mrf.mxu0 }
  0xa4   :  { %v208_v50 = vadd.f32 %v897_v47, %v207_v23 }
  0xa5   :  { %v248_v24 = vpop.f32.mrf.mxu1 }
  0xa6   :  { %v249_v53 = vadd.f32 %v248_v24, %v208_v50 }
  0xa9   :  { %v289_v43 = vpop.f32.mrf.mxu2 }
  0xaa   :  { %v290_v55 = vadd.f32 %v289_v43, %v249_v53 }
  0xab   :  { %v210_v27 = vpop.f32.mrf.mxu0 }
  0xac   :  { %v330_v45 = vpop.f32.mrf.mxu3  ;;  %v211_v56 = vadd.f32 %v897_v47, %v210_v27 }
  0xad   :  { %v251_v28 = vpop.f32.mrf.mxu1  ;;  %v331_v58 = vadd.f32 %v330_v45, %v290_v55 }
  0xae   :  { %v252_v60 = vadd.f32 %v251_v28, %v211_v56 }
  0xb1   :  { %v292_v49 = vpop.f32.mrf.mxu2 }
  0xb2   :  { %v293_v0 = vadd.f32 %v292_v49, %v252_v60 }
  0xb3   :  { %v213_v31 = vpop.f32.mrf.mxu0 }
  0xb4   :  { %v333_v51 = vpop.f32.mrf.mxu3  ;;  %v214_v2 = vadd.f32 %v897_v47, %v213_v31 }
  0xb5   :  { %v254_v32 = vpop.f32.mrf.mxu1  ;;  %v334_v4 = vadd.f32 %v333_v51, %v293_v0  ;;  %v517_v51 = vld [vmem:[%s985_s5 + $0x20] sm:$0xff] }
  0xb6   :  { %v255_v7 = vadd.f32 %v254_v32, %v214_v2  ;;  %v513_v2 = vld [vmem:[%s985_s5] sm:$0xff] }
  0xb9   :  { %v295_v57 = vpop.f32.mrf.mxu2 }
  0xba   :  { %v296_v10 = vadd.f32 %v295_v57, %v255_v7 }
  0xbb   :  { %v216_v35 = vpop.f32.mrf.mxu0 }
  0xbc   :  { %v336_v62 = vpop.f32.mrf.mxu3  ;;  %v217_v13 = vadd.f32 %v897_v47, %v216_v35 }
  0xbd   :  { %v257_v36 = vpop.f32.mrf.mxu1  ;;  %v337_v15 = vadd.f32 %v336_v62, %v296_v10 }
  0xbe   :  { %v258_v17 = vadd.f32 %v257_v36, %v217_v13 }
  0xc1   :  { %v298_v5 = vpop.f32.mrf.mxu2 }
  0xc2   :  { %v299_v21 = vadd.f32 %v298_v5, %v258_v17 }
  0xc3   :  { %v219_v39 = vpop.f32.mrf.mxu0 }
  0xc4   :  { %v339_v12 = vpop.f32.mrf.mxu3  ;;  %v220_v23 = vadd.f32 %v897_v47, %v219_v39 }
  0xc5   :  { %v260_v40 = vpop.f32.mrf.mxu1  ;;  %v340_v26 = vadd.f32 %v339_v12, %v299_v21 }
  0xc6   :  { %v261_v28 = vadd.f32 %v260_v40, %v220_v23 }
  0xc9   :  { %v301_v19 = vpop.f32.mrf.mxu2 }
  0xca   :  { %v302_v31 = vadd.f32 %v301_v19, %v261_v28 }
  0xcb   :  { %v222_v42 = vpop.f32.mrf.mxu0 }
  0xcc   :  { %v342_v25 = vpop.f32.mrf.mxu3  ;;  %v223_v34 = vadd.f32 %v897_v47, %v222_v42  ;;  %v518_v42 = vld [vmem:[%s985_s5 + $0x28] sm:$0xff] }
  0xcd   :  { %v890_v44 = vpop.f32.mrf.mxu1  ;;  %v343_v36 = vadd.f32 %v342_v25, %v302_v31  ;;  %560 = vmatpush.msrb.mxu3 %v518_v42 }
  0xce   :  { %v264_v41 = vadd.f32 %v890_v44, %v223_v34  ;;  %v516_v44 = vld [vmem:[%s985_s5 + $0x18] sm:$0xff] }
  0xcf   :  { %561 = vmatpush.msrb.mxu3 %v517_v51 }
  0xd1   :  { %v304_v33 = vpop.f32.mrf.mxu2  ;;  %562 = vmatpush.msrb.mxu3 %v516_v44 }
  0xd2   :  { %v305_v49 = vadd.f32 %v304_v33, %v264_v41 }
  0xd3   :  { %v892_v46 = vpop.f32.mrf.mxu0 }
  0xd4   :  { %v345_v39 = vpop.f32.mrf.mxu3  ;;  %v226_v53 = vadd.f32 %v897_v47, %v892_v46  ;;  %v514_v46 = vld [vmem:[%s985_s5 + $0x8] sm:$0xff] }
  0xd5   :  { %v899_v48 = vpop.f32.mrf.mxu1  ;;  %v346_v57 = vadd.f32 %v345_v39, %v305_v49 }
  0xd6   :  { %v267_v60 = vadd.f32 %v899_v48, %v226_v53 }
  0xd9   :  { %v307_v56 = vpop.f32.mrf.mxu2 }
  0xda   :  { %v308_v0 = vadd.f32 %v307_v56, %v267_v60 }
  0xdb   :  { %v902_v52 = vpop.f32.mrf.mxu0 }
  0xdc   :  { %v348_v62 = vpop.f32.mrf.mxu3 }
  0xdd   :  { %v904_v54 = vpop.f32.mrf.mxu1  ;;  %v349_v48 = vadd.f32 %v348_v62, %v308_v0 }
  0xe1   :  { %v310_v5 = vpop.f32.mrf.mxu2 }
  0xe3   :  { %v371_v59 = vpop.f32.mrf.mxu0 }
  0xe4   :  { %v372_v61 = vadd.f32 %v371_v59, %v331_v58  ;;  %v515_v58 = vld [vmem:[%s985_s5 + $0x10] sm:$0xff]  ;;  %v351_v12 = vpop.f32.mrf.mxu3 }
  0xe5   :  { %v412_v63 = vpop.f32.mrf.mxu1  ;;  %563 = vmatpush.msrb.mxu3 %v515_v58 }
  0xe6   :  { %v413_v1 = vadd.f32 %v412_v63, %v372_v61 }
  0xe7   :  { %564 = vmatpush.msrb.mxu3 %v514_v46 }
  0xe8   :  { %v436_v3 = vmax.f32 %v413_v1, 0.0 }
  0xe9   :  { %565 = vmatpush.msrb.mxu3 %v513_v2 }
  0xea   :  { %480 = vmatmul.f32.vlgmr.msrb.gmra.mxu2 %v436_v3  ;;  %v229_v3 = vadd.f32 %v897_v47, %v902_v52 }
  0xeb   :  { %v374_v6 = vpop.f32.mrf.mxu0 }
  0xec   :  { %v375_v8 = vadd.f32 %v374_v6, %v334_v4  ;;  %v270_v7 = vadd.f32 %v904_v54, %v229_v3 }
  0xed   :  { %v415_v9 = vpop.f32.mrf.mxu1 }
  0xee   :  { %v416_v11 = vadd.f32 %v415_v9, %v375_v8  ;;  %v311_v10 = vadd.f32 %v310_v5, %v270_v7 }
  0xf0   :  { %v437_v14 = vmax.f32 %v416_v11, 0.0 }
  0xf2   :  { %483 = vmatmul.f32.gmra.mxu2 %v437_v14  ;;  %v352_v14 = vadd.f32 %v351_v12, %v311_v10 }
  0xf3   :  { %v377_v16 = vpop.f32.mrf.mxu0 }
  0xf4   :  { %v378_v18 = vadd.f32 %v377_v16, %v337_v15 }
  0xf5   :  { %v418_v20 = vpop.f32.mrf.mxu1 }
  0xf6   :  { %v419_v22 = vadd.f32 %v418_v20, %v378_v18  ;;  %v624_v18 = vld [vmem:[%s984_s4] ss:$0 sm:$0xff] }
  0xf8   :  { %v438_v24 = vmax.f32 %v419_v22, 0.0 }
  0xfa   :  { %486 = vmatmul.f32.gmra.mxu2 %v438_v24 }
  0xfb   :  { %v380_v27 = vpop.f32.mrf.mxu0 }
  0xfc   :  { %v381_v29 = vadd.f32 %v380_v27, %v340_v26 }
  0xfd   :  { %v421_v30 = vpop.f32.mrf.mxu1 }
  0xfe   :  { %v422_v32 = vadd.f32 %v421_v30, %v381_v29 }
 0x100   :  { %v439_v35 = vmax.f32 %v422_v32, 0.0 }
 0x102   :  { %489 = vmatmul.f32.gmra.mxu2 %v439_v35 }
 0x103   :  { %v383_v40 = vpop.f32.mrf.mxu0 }
 0x104   :  { %v384_v43 = vadd.f32 %v383_v40, %v343_v36 }
 0x105   :  { %v424_v45 = vpop.f32.mrf.mxu1 }
 0x106   :  { %v425_v50 = vadd.f32 %v424_v45, %v384_v43  ;;  %v625_v43 = vld [vmem:[%s986_s6] ss:$0 sm:$0xff] }
 0x108   :  { %v440_v55 = vmax.f32 %v425_v50, 0.0 }
 0x10a   :  { %492 = vmatmul.f32.gmra.mxu2 %v440_v55 }
 0x10b   :  { %v386_v59 = vpop.f32.mrf.mxu0 }
 0x10c   :  { %v387_v61 = vadd.f32 %v386_v59, %v346_v57 }
 0x10d   :  { %v427_v63 = vpop.f32.mrf.mxu1 }
 0x10e   :  { %v428_v1 = vadd.f32 %v427_v63, %v387_v61 }
 0x110   :  { %v441_v4 = vmax.f32 %v428_v1, 0.0 }
 0x112   :  { %495 = vmatmul.f32.gmra.mxu2 %v441_v4 }
 0x113   :  { %v389_v6 = vpop.f32.mrf.mxu0 }
 0x114   :  { %v390_v8 = vadd.f32 %v389_v6, %v349_v48 }
 0x115   :  { %v430_v9 = vpop.f32.mrf.mxu1 }
 0x116   :  { %v431_v11 = vadd.f32 %v430_v9, %v390_v8 }
 0x118   :  { %v442_v13 = vmax.f32 %v431_v11, 0.0 }
 0x11a   :  { %498 = vmatmul.f32.gmra.mxu2 %v442_v13 }
 0x11b   :  { %v392_v15 = vpop.f32.mrf.mxu0 }
 0x11c   :  { %v393_v16 = vadd.f32 %v392_v15, %v352_v14 }
 0x11d   :  { %v433_v17 = vpop.f32.mrf.mxu1 }
 0x11e   :  { %v434_v47 = vadd.f32 %v433_v17, %v393_v16 }
 0x120   :  { %v443_v52 = vmax.f32 %v434_v47, 0.0 }
 0x122   :  { %501 = vmatmul.f32.gmra.mxu2 %v443_v52 }
 0x16d   :  { %v481_v19 = vpop.f32.mrf.mxu2 }
 0x16e   :  { %v482_v54 = vadd.f32 %v624_v18, %v481_v19 }
 0x170   :  { %v505_v20 = vmax.f32 %v482_v54, 0.0 }
 0x172   :  { %612 = vmatmul.msk.f32.vlgmr.msrb.gmra.mxu3 %vm525_vm0, %v505_v20 }
 0x175   :  { %v484_v21 = vpop.f32.mrf.mxu2 }
 0x176   :  { %v485_v22 = vadd.f32 %v624_v18, %v484_v21 }
 0x178   :  { %v506_v23 = vmax.f32 %v485_v22, 0.0 }
 0x17a   :  { %613 = vmatmul.msk.f32.gmra.mxu3 %vm525_vm0, %v506_v23 }
 0x17d   :  { %v487_v24 = vpop.f32.mrf.mxu2 }
 0x17e   :  { %v488_v25 = vadd.f32 %v624_v18, %v487_v24 }
 0x180   :  { %v507_v26 = vmax.f32 %v488_v25, 0.0 }
 0x182   :  { %614 = vmatmul.msk.f32.gmra.mxu3 %vm525_vm0, %v507_v26 }
 0x185   :  { %v490_v27 = vpop.f32.mrf.mxu2 }
 0x186   :  { %v491_v28 = vadd.f32 %v624_v18, %v490_v27 }
 0x188   :  { %v508_v29 = vmax.f32 %v491_v28, 0.0 }
 0x18a   :  { %615 = vmatmul.msk.f32.gmra.mxu3 %vm525_vm0, %v508_v29 }
 0x18d   :  { %v493_v30 = vpop.f32.mrf.mxu2 }
 0x18e   :  { %v494_v31 = vadd.f32 %v624_v18, %v493_v30 }
 0x190   :  { %v509_v32 = vmax.f32 %v494_v31, 0.0 }
 0x192   :  { %616 = vmatmul.msk.f32.gmra.mxu3 %vm525_vm0, %v509_v32 }
 0x195   :  { %v496_v33 = vpop.f32.mrf.mxu2 }
 0x196   :  { %v497_v34 = vadd.f32 %v624_v18, %v496_v33 }
 0x198   :  { %v510_v35 = vmax.f32 %v497_v34, 0.0 }
 0x19a   :  { %617 = vmatmul.msk.f32.gmra.mxu3 %vm525_vm0, %v510_v35 }
 0x19d   :  { %v499_v36 = vpop.f32.mrf.mxu2 }
 0x19e   :  { %v500_v37 = vadd.f32 %v624_v18, %v499_v36 }
 0x1a0   :  { %v511_v38 = vmax.f32 %v500_v37, 0.0 }
 0x1a2   :  { %618 = vmatmul.msk.f32.gmra.mxu3 %vm525_vm0, %v511_v38 }
 0x1a5   :  { %v502_v39 = vpop.f32.mrf.mxu2 }
 0x1a6   :  { %v503_v40 = vadd.f32 %v624_v18, %v502_v39 }
 0x1a8   :  { %v512_v41 = vmax.f32 %v503_v40, 0.0 }
 0x1aa   :  { %619 = vmatmul.msk.f32.gmra.mxu3 %vm525_vm0, %v512_v41 }
 0x1f5   :  { %v567_v42 = vpop.f32.mrf.mxu3 }
 0x1f6   :  { %v568_v45 = vadd.f32 %v625_v43, %v567_v42 }
 0x1f8   :  { %v591_v49 = vmax.f32 %v568_v45, 0.0 }
 0x1fa   :  { %599 = vst [vmem:[%s987_s7] sm:$0xff] %v591_v49 }
 0x1fd   :  { %v570_v50 = vpop.f32.mrf.mxu3 }
 0x1fe   :  { %v571_v51 = vadd.f32 %v625_v43, %v570_v50 }
 0x200   :  { %v592_v53 = vmax.f32 %v571_v51, 0.0 }
 0x202   :  { %600 = vst [vmem:[%s987_s7 + $0x8] sm:$0xff] %v592_v53 }
 0x205   :  { %v573_v55 = vpop.f32.mrf.mxu3 }
 0x206   :  { %v574_v44 = vadd.f32 %v625_v43, %v573_v55 }
 0x208   :  { %v593_v56 = vmax.f32 %v574_v44, 0.0 }
 0x20a   :  { %601 = vst [vmem:[%s987_s7 + $0x10] sm:$0xff] %v593_v56 }
 0x20d   :  { %v576_v57 = vpop.f32.mrf.mxu3 }
 0x20e   :  { %v577_v58 = vadd.f32 %v625_v43, %v576_v57 }
 0x210   :  { %v594_v59 = vmax.f32 %v577_v58, 0.0 }
 0x212   :  { %602 = vst [vmem:[%s987_s7 + $0x18] sm:$0xff] %v594_v59 }
 0x215   :  { %v579_v60 = vpop.f32.mrf.mxu3 }
 0x216   :  { %v580_v61 = vadd.f32 %v625_v43, %v579_v60 }
 0x218   :  { %v595_v46 = vmax.f32 %v580_v61, 0.0 }
 0x21a   :  { %603 = vst [vmem:[%s987_s7 + $0x20] sm:$0xff] %v595_v46 }
 0x21d   :  { %v582_v62 = vpop.f32.mrf.mxu3 }
 0x21e   :  { %v583_v63 = vadd.f32 %v625_v43, %v582_v62 }
 0x220   :  { %v596_v0 = vmax.f32 %v583_v63, 0.0 }
 0x222   :  { %604 = vst [vmem:[%s987_s7 + $0x28] sm:$0xff] %v596_v0 }
 0x225   :  { %v585_v1 = vpop.f32.mrf.mxu3 }
 0x226   :  { %v586_v2 = vadd.f32 %v625_v43, %v585_v1 }
 0x228   :  { %v597_v3 = vmax.f32 %v586_v2, 0.0 }
 0x22a   :  { %605 = vst [vmem:[%s987_s7 + $0x30] sm:$0xff] %v597_v3 }
 0x22d   :  { %v588_v4 = vpop.f32.mrf.mxu3 }
 0x22e   :  { %v589_v48 = vadd.f32 %v625_v43, %v588_v4 }
 0x230   :  { %v598_v5 = vmax.f32 %v589_v48, 0.0 }
 0x232   :  { %606 = vst [vmem:[%s987_s7 + $0x38] sm:$0xff] %v598_v5 }
 0x233   :  { %611 = vsyncpa [#allocation3], 1 }

</bundles_post_ra>
